<compile_context>
chip_gen: v5e
topology: v5e:2x2
jax: 0.10.0
libtpu: 0.0.40
codegen_flags: <defaults>
</compile_context>

<pallas_src>
import functools

import jax
import jax.numpy as jnp
from jax import lax
from jax.experimental import pallas as pl
from jax.experimental.pallas import tpu as pltpu

_LANE = 128
_SUBLANE = 8
_MAX_CHUNKS = 64          # cap on statically unrolled chunk bodies per step


def _ceil_div(a, b):
    return -(-a // b)


def _dice_partial_kernel(x_ref, t_ref, num_ref, den_ref, *,
                         n_chunks, cw, steps, tail, use_locals):
    """Grid = (row_block ["parallel"], spatial_step ["arbitrary"]).

    x_ref, t_ref : (R, TS) tiles of logits / targets (any float dtype).
    num_ref      : (R, CW) running lane-partials of sum(p * t)          (f32).
    den_ref      : (R, CW) running lane-partials of sum(p) + sum(t)     (f32).
    """
    s = pl.program_id(1)
    rows = num_ref.shape[0]

    @pl.when(s == 0)
    def _():
        num_ref[...] = jnp.zeros_like(num_ref)
        den_ref[...] = jnp.zeros_like(den_ref)

    def accumulate(masked):
        # Local (vreg-resident) accumulators: one ref += per step instead of
        # one per chunk (keeps v5e's single vector-store slot unsaturated).
        if use_locals:
            acc_n = jnp.zeros((rows, cw), jnp.float32)
            acc_d = jnp.zeros((rows, cw), jnp.float32)
        for k in range(n_chunks):
            start = k * cw
            if masked and start >= tail:
                break                                   # fully past the tail
            x = x_ref[:, start:start + cw].astype(jnp.float32)
            t = t_ref[:, start:start + cw].astype(jnp.float32)
            p = 0.5 * (jnp.tanh(0.5 * x) + 1.0)         # == sigmoid(x), 1 EUP push
            if masked and start + cw > tail:
                # Static mask: only the single partial chunk of the last step
                # pays these extra VPU ops.
                lane = lax.broadcasted_iota(jnp.int32, (rows, cw), 1)
                valid = lane < (tail - start)
                p = jnp.where(valid, p, 0.0)
                t = jnp.where(valid, t, 0.0)
            if use_locals:
                acc_n = acc_n + p * t
                acc_d = acc_d + (p + t)
            else:
                num_ref[...] += p * t
                den_ref[...] += p + t
        if use_locals:
            num_ref[...] += acc_n
            den_ref[...] += acc_d

    if tail == 0:                      # tile width divides H*W: never mask
        accumulate(False)
    elif steps == 1:                   # single (partial) step: always mask
        accumulate(True)
    else:                              # mask only on the last step
        @pl.when(s < steps - 1)
        def _():
            accumulate(False)

        @pl.when(s == steps - 1)
        def _():
            accumulate(True)


def _vmem_budgets():
    """(input_budget_bytes, vmem_limit_bytes), generation aware."""
    try:
        cap = int(pltpu.get_tpu_info().vmem_capacity_bytes)
    except Exception:
        cap = 64 * 1024 * 1024          # conservative: v7x has 64 MiB per core
    vmem_limit = min(int(cap * 3 // 4), 100 * 1024 * 1024)
    input_budget = max(8 * 1024 * 1024, vmem_limit - 8 * 1024 * 1024)
    return input_budget, vmem_limit


def dice_loss_msd(predict, target, smooth=1.0):
    """predict, target: (N, C, H, W) logits / binary targets. Scalar f32 loss."""
    assert predict.shape == target.shape
    N, C, H, W = predict.shape
    NC, HW = N * C, H * W

    # ---- row blocking ("parallel" grid axis) -------------------------------
    if NC % _SUBLANE == 0:
        r_blk = min(NC, 64)              # multiple of 8, bounded vreg pressure
    else:
        r_blk = NC                       # ragged N*C: full-dim block (allowed)
    row_blocks = _ceil_div(NC, r_blk)
    rows_total = row_blocks * r_blk      # output rows (garbage rows sliced off)

    # ---- spatial tiling (reduction axis, innermost) -------------------------
    input_budget, vmem_limit = _vmem_budgets()
    itemsize = predict.dtype.itemsize + target.dtype.itemsize

    if HW < _LANE:
        cw = ts = HW                     # single full-dim (non-128) block
    else:
        r_vregs = _ceil_div(r_blk, _SUBLANE)
        cw = _LANE * max(1, min(8, 8 // r_vregs))       # chunk/accumulator width
        hw128 = (HW // _LANE) * _LANE    # keep blocks no wider than the array
        cw = min(cw, hw128)
        bytes_per_lane = 2 * r_blk * itemsize           # 2 pipeline buffers
        ts_budget = (input_budget // bytes_per_lane) // cw * cw
        ts_cap = _MAX_CHUNKS * cw
        ts = max(cw, min(ts_budget, ts_cap, (hw128 // cw) * cw))

    n_chunks = ts // cw
    steps = _ceil_div(HW, ts)
    tail = HW - (steps - 1) * ts
    tail = 0 if tail == ts else tail     # 0 => tile width divides HW exactly

    acc_vregs = 2 * _ceil_div(r_blk, _SUBLANE) * _ceil_div(cw, _LANE)
    use_locals = acc_vregs <= 32         # avoid spilling for very tall blocks

    x2 = predict.reshape(NC, HW)         # no padding, no copies
    t2 = target.reshape(NC, HW)

    kernel = functools.partial(
        _dice_partial_kernel, n_chunks=n_chunks, cw=cw,
        steps=steps, tail=tail, use_locals=use_locals)

    num_part, den_part = pl.pallas_call(
        kernel,
        out_shape=(
            jax.ShapeDtypeStruct((rows_total, cw), jnp.float32),
            jax.ShapeDtypeStruct((rows_total, cw), jnp.float32),
        ),
        grid_spec=pltpu.PrefetchScalarGridSpec(
            num_scalar_prefetch=0,
            grid=(row_blocks, steps),
            in_specs=[
                pl.BlockSpec((r_blk, ts), lambda r, s: (r, s)),
                pl.BlockSpec((r_blk, ts), lambda r, s: (r, s)),
            ],
            out_specs=(
                pl.BlockSpec((r_blk, cw), lambda r, s: (r, 0)),
                pl.BlockSpec((r_blk, cw), lambda r, s: (r, 0)),
            ),
        ),
        compiler_params=pltpu.CompilerParams(
            dimension_semantics=("parallel", "arbitrary"),
            vmem_limit_bytes=vmem_limit,
        ),
    )(x2, t2)

    # Tiny epilogue on a few hundred floats: reduce lane partials, Dice formula.
    num = jnp.sum(num_part[:NC], axis=1)                # (N*C,)
    den = jnp.sum(den_part[:NC], axis=1)                # (N*C,)
    dice = 2.0 * num / (den + smooth)                   # (N*C,)
    per_channel_loss = 1.0 - jnp.mean(dice.reshape(N, C), axis=0)   # (C,)
    return jnp.sum(per_channel_loss) / C


def _reference(predict, target, smooth=1.0):
    """Pure-JAX reference mirroring the PyTorch module (ignore_index=None)."""
    N, C = predict.shape[:2]
    p = jax.nn.sigmoid(predict.astype(jnp.float32)).reshape(N, C, -1)
    t = target.reshape(N, C, -1).astype(jnp.float32)
    num = jnp.sum(p * t, axis=-1)                       # (N, C)
    den = jnp.sum(p, axis=-1) + jnp.sum(t, axis=-1) + smooth
    dice = 2.0 * num / den
    per_channel = 1.0 - jnp.mean(dice, axis=0)          # (C,)
    return jnp.sum(per_channel) / C


if __name__ == "__main__":
    key = jax.random.PRNGKey(0)
    k1, k2 = jax.random.split(key)

    N, C, H, W = 2, 4, 16, 16
    predict = jax.random.normal(k1, (N, C, H, W), dtype=jnp.float32)
    # Binary-ish targets (0/1), as typical for dice loss.
    target = (jax.random.uniform(k2, (N, C, H, W)) > 0.5).astype(jnp.float32)

    loss = dice_loss_msd(predict, target, smooth=1.0)
    jax.block_until_ready(loss)

    ref = _reference(predict, target, smooth=1.0)
    assert jnp.allclose(loss, ref, atol=1e-5, rtol=1e-5), (loss, ref)

    print("KERNEL_OK")
</pallas_src>

<mosaic_0001>
module attributes {stable_mosaic.version = 11 : i64} {
  func.func @_dice_partial_kernel(%arg0: i32, %arg1: i32, %arg2: memref<8x256xf32, #tpu.memory_space<vmem>>, %arg3: memref<8x256xf32, #tpu.memory_space<vmem>>, %arg4: memref<8x256xf32, #tpu.memory_space<vmem>>, %arg5: memref<8x256xf32, #tpu.memory_space<vmem>>) attributes {dimension_semantics = [#tpu.dimension_semantics<parallel>, #tpu.dimension_semantics<arbitrary>], iteration_bounds = array<i64: 1, 1>, scalar_prefetch = 0 : i64, scratch_operands = 0 : i64, tpu.core_type = #tpu.core_type<tc>, window_params = [{transform_indices = @transform_0, window_bounds = array<i64: 8, 256>}, {transform_indices = @transform_1, window_bounds = array<i64: 8, 256>}, {transform_indices = @transform_2, window_bounds = array<i64: 8, 256>}, {transform_indices = @transform_3, window_bounds = array<i64: 8, 256>}]} {
    %c0_i32 = arith.constant 0 : i32
    %0 = arith.cmpi eq, %arg1, %c0_i32 : i32
    %1 = arith.extui %0 : i1 to i32
    %c0_i32_0 = arith.constant 0 : i32
    %2 = arith.cmpi ne, %1, %c0_i32_0 : i32
    scf.if %2 {
      %cst_16 = arith.constant 0.000000e+00 : f32
      %24 = vector.broadcast %cst_16 : f32 to vector<8x256xf32>
      %c0_17 = arith.constant 0 : index
      %c0_18 = arith.constant 0 : index
      %25 = vector.load %arg4[%c0_17, %c0_18] : memref<8x256xf32, #tpu.memory_space<vmem>>, vector<8x256xf32>
      tpu.vector_store %arg4[%c0_17, %c0_18], %24 {strides = array<i32>} : memref<8x256xf32, #tpu.memory_space<vmem>>, vector<8x256xf32>,
      %cst_19 = arith.constant 0.000000e+00 : f32
      %26 = vector.broadcast %cst_19 : f32 to vector<8x256xf32>
      %c0_20 = arith.constant 0 : index
      %c0_21 = arith.constant 0 : index
      %27 = vector.load %arg5[%c0_20, %c0_21] : memref<8x256xf32, #tpu.memory_space<vmem>>, vector<8x256xf32>
      tpu.vector_store %arg5[%c0_20, %c0_21], %26 {strides = array<i32>} : memref<8x256xf32, #tpu.memory_space<vmem>>, vector<8x256xf32>,
    } else {
    }
    %cst = arith.constant 0.000000e+00 : f32
    %3 = vector.broadcast %cst : f32 to vector<8x256xf32>
    %cst_1 = arith.constant 0.000000e+00 : f32
    %4 = vector.broadcast %cst_1 : f32 to vector<8x256xf32>
    %c0 = arith.constant 0 : index
    %c0_2 = arith.constant 0 : index
    %5 = vector.load %arg2[%c0, %c0_2] : memref<8x256xf32, #tpu.memory_space<vmem>>, vector<8x256xf32>
    %c0_3 = arith.constant 0 : index
    %c0_4 = arith.constant 0 : index
    %6 = vector.load %arg3[%c0_3, %c0_4] : memref<8x256xf32, #tpu.memory_space<vmem>>, vector<8x256xf32>
    %cst_5 = arith.constant 5.000000e-01 : f32
    %7 = vector.broadcast %cst_5 : f32 to vector<8x256xf32>
    %8 = arith.mulf %7, %5 : vector<8x256xf32>
    %9 = math.tanh %8 : vector<8x256xf32>
    %cst_6 = arith.constant 1.000000e+00 : f32
    %10 = vector.broadcast %cst_6 : f32 to vector<8x256xf32>
    %11 = arith.addf %9, %10 : vector<8x256xf32>
    %cst_7 = arith.constant 5.000000e-01 : f32
    %12 = vector.broadcast %cst_7 : f32 to vector<8x256xf32>
    %13 = arith.mulf %12, %11 : vector<8x256xf32>
    %14 = arith.mulf %13, %6 : vector<8x256xf32>
    %15 = arith.addf %3, %14 : vector<8x256xf32>
    %16 = arith.addf %13, %6 : vector<8x256xf32>
    %17 = arith.addf %4, %16 : vector<8x256xf32>
    %c0_8 = arith.constant 0 : index
    %c0_9 = arith.constant 0 : index
    %18 = vector.load %arg4[%c0_8, %c0_9] : memref<8x256xf32, #tpu.memory_space<vmem>>, vector<8x256xf32>
    %19 = arith.addf %18, %15 : vector<8x256xf32>
    %c0_10 = arith.constant 0 : index
    %c0_11 = arith.constant 0 : index
    %20 = vector.load %arg4[%c0_10, %c0_11] : memref<8x256xf32, #tpu.memory_space<vmem>>, vector<8x256xf32>
    tpu.vector_store %arg4[%c0_10, %c0_11], %19 {strides = array<i32>} : memref<8x256xf32, #tpu.memory_space<vmem>>, vector<8x256xf32>,
    %c0_12 = arith.constant 0 : index
    %c0_13 = arith.constant 0 : index
    %21 = vector.load %arg5[%c0_12, %c0_13] : memref<8x256xf32, #tpu.memory_space<vmem>>, vector<8x256xf32>
    %22 = arith.addf %21, %17 : vector<8x256xf32>
    %c0_14 = arith.constant 0 : index
    %c0_15 = arith.constant 0 : index
    %23 = vector.load %arg5[%c0_14, %c0_15] : memref<8x256xf32, #tpu.memory_space<vmem>>, vector<8x256xf32>
    tpu.vector_store %arg5[%c0_14, %c0_15], %22 {strides = array<i32>} : memref<8x256xf32, #tpu.memory_space<vmem>>, vector<8x256xf32>,
    return
  }
  func.func @transform_0(%arg0: i32, %arg1: i32) -> (i32, i32) {
    %c0_i32 = arith.constant 0 : i32
    return %arg0, %arg1 : i32, i32
  }
  func.func @transform_1(%arg0: i32, %arg1: i32) -> (i32, i32) {
    %c0_i32 = arith.constant 0 : i32
    return %arg0, %arg1 : i32, i32
  }
  func.func @transform_2(%arg0: i32, %arg1: i32) -> (i32, i32) {
    %c0_i32 = arith.constant 0 : i32
    %c0_i32_0 = arith.constant 0 : i32
    return %arg0, %c0_i32 : i32, i32
  }
  func.func @transform_3(%arg0: i32, %arg1: i32) -> (i32, i32) {
    %c0_i32 = arith.constant 0 : i32
    %c0_i32_0 = arith.constant 0 : i32
    return %arg0, %c0_i32 : i32, i32
  }
}

</mosaic_0001>

<bundles_post_ra>
// kernel: tpu_custom_call.1
= control target key start
LH: loop header
LB: loop body
LE: loop exit
PB: predicated region body
PF: predicated region fallthrough
CT: control target
= control target key end

     0   :  { %9 = vsyncpa [#allocation3], 0  ;;  %s266_s0 = inlined_call_operand.hbm [shape: f32[8,256], index: 0, kind: input, shape index: {}]   ;;  %s267_s1 = inlined_call_operand.hbm [shape: f32[8,256], index: 1, kind: input, shape index: {}]   ;;  %s268_s2 = inlined_call_operand.hbm [shape: f32[8,256], index: 2, kind: output, shape index: {0}]   ;;  %s269_s3 = inlined_call_operand.hbm [shape: f32[8,256], index: 3, kind: output, shape index: {1}]  }
   0x1   :  { %10 = vsyncpa [#allocation6], 0 }
   0x2   :  { %11 = vsyncpa [#allocation4], 0 }
   0x3   :  { %12 = vsyncpa [#allocation9], 0  ;;  %s18_s14 = sshll.u32 %s266_s0, 4  ;;  %s230_s15 = smov [#allocation2]   ;;  %s19_s14 = int_to_ptr.hbm [resolvable:$true] %s18_s14 }
   0x4   :  { %s20_s16 = sshll.u32 %s230_s15, 4  ;;  %s29_s19 = sshll.u32 %s267_s1, 4  ;;  %s21_s16 = int_to_ptr.vmem [resolvable:$true] %s20_s16  ;;  %s30_s19 = int_to_ptr.hbm [resolvable:$true] %s29_s19 }
   0x5   :  { %23 = dma.hbm_to_vmem [thread:$0]  %s19_s14, 256, %s21_s16, [#allocation3]  }
   0x6   :  { %s231_s20 = smov [#allocation5]  }
   0x7   :  { %s31_s21 = sshll.u32 %s231_s20, 4  ;;  %s32_s21 = int_to_ptr.vmem [resolvable:$true] %s31_s21 }
   0x8   :  { %34 = dma.hbm_to_vmem [thread:$0]  %s30_s19, 256, %s32_s21, [#allocation6]  }
   0x9   :  { %222 = dma.done.wait [#allocation3], 256  }
   0xa   :  { %223 = vsyncadd [#allocation3], 4294967040 }
   0xb   :  { %224 = dma.done.wait [#allocation6], 256  }
   0xc   :  { %225 = vsyncadd [#allocation6], 4294967040  ;;  %v51_v0 = vld [vmem:[#allocation2] sm:$0xff]  ;;  %v52_v1 = vld [vmem:[#allocation2 + $0x8] sm:$0xff]  ;;  %s232_s0 = smov [#allocation7]   ;;  %s90_s24 = sshll.u32 %s268_s2, 4  ;;  %s91_s24 = int_to_ptr.hbm [resolvable:$true] %s90_s24 }
   0xd   :  { %v55_v2 = vmul.f32 0.5, %v51_v0  ;;  %v56_v3 = vmul.f32 0.5, %v52_v1  ;;  %v53_v7 = vld [vmem:[#allocation5] sm:$0xff]  ;;  %v54_v10 = vld [vmem:[#allocation5 + $0x8] sm:$0xff]  ;;  %s88_s1 = sshll.u32 %s232_s0, 4  ;;  %s233_s25 = smov [#allocation8]   ;;  %s89_s1 = int_to_ptr.vmem [resolvable:$true] %s88_s1 }
   0xe   :  { %s99_s26 = sshll.u32 %s233_s25, 4  ;;  %s101_s29 = sshll.u32 %s269_s3, 4  ;;  %s100_s26 = int_to_ptr.vmem [resolvable:$true] %s99_s26  ;;  %s102_s29 = int_to_ptr.hbm [resolvable:$true] %s101_s29 }
   0xf   :  { %122 = vtanh.f32 %v55_v2 }
  0x10   :  { %124 = vtanh.f32 %v56_v3 }
  0x15   :  { %v123_v4 = vpop.eup %122 }
  0x16   :  { %v125_v5 = vpop.eup %124  ;;  %v59_v6 = vadd.f32 1.0, %v123_v4 }
  0x17   :  { %v60_v8 = vadd.f32 1.0, %v125_v5 }
  0x18   :  { %v61_v9 = vmul.f32 0.5, %v59_v6 }
  0x19   :  { %v62_v11 = vmul.f32 0.5, %v60_v8 }
  0x1a   :  { %v63_v12 = vmul.f32 %v61_v9, %v53_v7  ;;  %v67_v13 = vadd.f32 %v61_v9, %v53_v7 }
  0x1b   :  { %v64_v14 = vmul.f32 %v62_v11, %v54_v10  ;;  %v68_v15 = vadd.f32 %v62_v11, %v54_v10 }
  0x1c   :  { %75 = vst [vmem:[#allocation7] sm:$0xff] %v63_v12 }
  0x1d   :  { %76 = vst [vmem:[#allocation7 + $0x8] sm:$0xff] %v64_v14 }
  0x1e   :  { %81 = vst [vmem:[#allocation8] sm:$0xff] %v67_v13  ;;  %93 = dma.vmem_to_hbm [thread:$0]  %s89_s1, 256, %s91_s24, [#allocation4]  }
  0x1f   :  { %82 = vst [vmem:[#allocation8 + $0x8] sm:$0xff] %v68_v15 }
  0x20   :  { %104 = dma.vmem_to_hbm [thread:$0]  %s100_s26, 256, %s102_s29, [#allocation9]  }
  0x21   :  { %226 = dma.done.wait [#allocation4], 256  }
  0x22   :  { %227 = vsyncadd [#allocation4], 4294967040 }
  0x23   :  { %228 = dma.done.wait [#allocation9], 256  }
  0x24   :  { %229 = vsyncadd [#allocation9], 4294967040 }
  0x25   :  { %113 = vsyncpa [#allocation3], 1 }
  0x26   :  { %114 = vsyncpa [#allocation6], 1 }
  0x27   :  { %115 = vsyncpa [#allocation4], 1 }
  0x28   :  { %116 = vsyncpa [#allocation9], 1 }

</bundles_post_ra>
